<compile_context>
chip_gen: v6e
topology: v6e:2x2x1
jax: 0.10.0
libtpu: 0.0.40
codegen_flags: <defaults>
</compile_context>

<pallas_src>
import functools

import jax
import jax.numpy as jnp
from jax import lax
from jax.experimental import pallas as pl
from jax.experimental.pallas import tpu as pltpu

_LANE = 128


def _round_up(n, m):
    return ((n + m - 1) // m) * m


_ACTIVATIONS = {
    "tanh": jnp.tanh,
    "relu": lambda x: jnp.maximum(x, 0.0),
}


def _qvalue_kernel(s_ref, a_ref, w1s_ref, w1a_ref, b1_ref, w2_ref, b2_ref,
                   w3r_ref, b3_ref, out_ref, *, act):
    """Fused 3-layer MLP on one batch tile; emits a lane-dense (1, TB) q row.

    h1 = act(s @ W1s + a @ W1a + b1)     (concat([s, a]) @ W1 fused away)
    h2 = act(h1 @ W2 + b2)
    q  = W3_row @ h2^T + b3              (NT matmul -> (1, TB), lane-major)
    """
    s = s_ref[...].astype(jnp.float32)
    a = a_ref[...].astype(jnp.float32)
    h1 = act(
        jnp.dot(s, w1s_ref[...], preferred_element_type=jnp.float32)
        + jnp.dot(a, w1a_ref[...], preferred_element_type=jnp.float32)
        + b1_ref[...])
    h2 = act(
        jnp.dot(h1, w2_ref[...], preferred_element_type=jnp.float32)
        + b2_ref[...])
    # Last layer as (1, H2) contracted with (TB, H2) on the last dim of both
    # (same NT dot flash-attention uses for q @ k^T): result is (1, TB), i.e.
    # the q values come out of the MXU already lane-dense, so no in-kernel
    # transpose and the HBM writeback is 4 B/row.
    q = lax.dot_general(
        w3r_ref[...], h2,
        dimension_numbers=(((1,), (1,)), ((), ())),
        preferred_element_type=jnp.float32)
    out_ref[...] = q + b3_ref[...]


def prepare_qvalue_params(params, state_dim):
    """One-time lane-dense padding / splitting of the MLP weights.

    Hoisted out of the forward pass (perf review): the padded copies are tiny
    and constant, so they are built once and reused by every qvalue_forward.
    """
    assert len(params) == 3, "kernel is specialized to 2 hidden layers"
    (w1, b1), (w2, b2), (w3, b3) = params
    in_dim, h1_dim = w1.shape
    h2_dim = w2.shape[1]
    action_dim = in_dim - state_dim
    h1_pad = _round_up(h1_dim, _LANE)
    h2_pad = _round_up(h2_dim, _LANE)

    f32 = jnp.float32
    w1 = w1.astype(f32)
    w2 = w2.astype(f32)
    w3 = w3.astype(f32)
    b1 = jnp.reshape(b1, (1, -1)).astype(f32)
    b2 = jnp.reshape(b2, (1, -1)).astype(f32)
    b3 = jnp.reshape(b3, (1, 1)).astype(f32)

    # W1 split into state rows / action rows so the kernel never needs the
    # concatenated input; zero padding keeps padded lanes inert.
    w1s = jnp.zeros((state_dim, h1_pad), f32).at[:, :h1_dim].set(w1[:state_dim])
    w1a = jnp.zeros((action_dim, h1_pad), f32).at[:, :h1_dim].set(w1[state_dim:])
    b1p = jnp.zeros((1, h1_pad), f32).at[:, :h1_dim].set(b1)
    w2p = jnp.zeros((h1_pad, h2_pad), f32).at[:h1_dim, :h2_dim].set(w2)
    b2p = jnp.zeros((1, h2_pad), f32).at[:, :h2_dim].set(b2)
    # Last layer stored as a row vector (1, h2_pad) for the NT dot.
    w3r = jnp.zeros((1, h2_pad), f32).at[:, :h2_dim].set(jnp.reshape(w3, (1, -1)))

    return dict(w1s=w1s, w1a=w1a, b1=b1p, w2=w2p, b2=b2p, w3r=w3r, b3=b3,
                dims=(state_dim, action_dim, h1_dim, h2_dim))


def qvalue_forward(state, action, prepared, *, activation="tanh", tile_b=2048):
    """Q(state, action) with a batch-gridded Pallas kernel. Returns (B,)."""
    act = _ACTIVATIONS[activation]
    state_dim, action_dim, h1_dim, h2_dim = prepared["dims"]
    assert state.shape[-1] == state_dim and action.shape[-1] == action_dim
    batch = state.shape[0]

    # ---- batch tiling: lane-dense tiles (multiples of 128) ------------------
    tile_b = max(_LANE, min(_round_up(tile_b, _LANE), _round_up(batch, _LANE)))
    # Keep >= 2 grid steps for mid-size batches so the ("parallel",) axis can
    # spread over both TensorCores on v7x (harmless on v5e/v6e).
    if batch > _LANE:
        tile_b = min(tile_b, _round_up(pl.cdiv(batch, 2), _LANE))
    num_tiles = pl.cdiv(batch, tile_b)
    batch_pad = num_tiles * tile_b
    if batch_pad != batch:
        state = jnp.pad(state, ((0, batch_pad - batch), (0, 0)))
        action = jnp.pad(action, ((0, batch_pad - batch), (0, 0)))

    # ---- advisory cost estimate (semantic widths, no concat/padded output) --
    in_bytes = (state.dtype.itemsize * batch_pad * state_dim
                + action.dtype.itemsize * batch_pad * action_dim)
    weight_bytes = 4 * sum(int(prepared[k].size)
                           for k in ("w1s", "w1a", "b1", "w2", "b2", "w3r", "b3"))
    flops = 2 * batch * ((state_dim + action_dim) * h1_dim
                         + h1_dim * h2_dim + h2_dim)
    transcendentals = batch * (h1_dim + h2_dim) if activation == "tanh" else 0

    kernel = functools.partial(_qvalue_kernel, act=act)

    def _resident(arr):  # tiny weights: constant index_map -> stay in VMEM
        return pl.BlockSpec(arr.shape, lambda i: (0, 0))

    out = pl.pallas_call(
        kernel,
        out_shape=jax.ShapeDtypeStruct((1, batch_pad), jnp.float32),
        grid=(num_tiles,),
        in_specs=[
            # only state / action stream with the batch grid axis
            pl.BlockSpec((tile_b, state_dim), lambda i: (i, 0)),
            pl.BlockSpec((tile_b, action_dim), lambda i: (i, 0)),
            _resident(prepared["w1s"]),
            _resident(prepared["w1a"]),
            _resident(prepared["b1"]),
            _resident(prepared["w2"]),
            _resident(prepared["b2"]),
            _resident(prepared["w3r"]),
            _resident(prepared["b3"]),
        ],
        out_specs=pl.BlockSpec((1, tile_b), lambda i: (0, i)),
        compiler_params=pltpu.CompilerParams(
            dimension_semantics=("parallel",)),
        cost_estimate=pl.CostEstimate(
            flops=int(flops),
            transcendentals=int(transcendentals),
            bytes_accessed=int(in_bytes + weight_bytes + 4 * batch_pad)),
    )(state, action, prepared["w1s"], prepared["w1a"], prepared["b1"],
      prepared["w2"], prepared["b2"], prepared["w3r"], prepared["b3"])

    # lane-dense (1, batch_pad) row; drop batch padding and squeeze like torch
    return out[0, :batch]


def init_qvalue_params(key, state_dim, action_dim, hidden_sizes):
    """Deterministic init mirroring QValueFunction.__init__ (raw params)."""
    sizes = [state_dim + action_dim] + list(hidden_sizes) + [1]
    params = []
    keys = jax.random.split(key, 2 * (len(sizes) - 1))
    for j in range(len(sizes) - 1):
        fan_in, fan_out = sizes[j], sizes[j + 1]
        kw, kb = keys[2 * j], keys[2 * j + 1]
        if j == len(sizes) - 2:
            bound = 0.0005            # last layer: nn.init.uniform_(-5e-4, 5e-4)
        else:
            bound = 1.0 / float(fan_in) ** 0.5   # nn.Linear default
        w = jax.random.uniform(kw, (fan_in, fan_out), jnp.float32,
                               minval=-bound, maxval=bound)
        b = jax.random.uniform(kb, (1, fan_out), jnp.float32,
                               minval=-bound, maxval=bound)
        params.append((w, b))
    return params


def reference_forward(state, action, params, *, activation="tanh"):
    """Pure-JAX reference for correctness check."""
    act = _ACTIVATIONS[activation]
    (w1, b1), (w2, b2), (w3, b3) = params
    x = jnp.concatenate([state, action], axis=-1)
    h = act(x @ w1 + b1)
    h = act(h @ w2 + b2)
    q = h @ w3 + b3
    return jnp.squeeze(q, axis=-1)


if __name__ == "__main__":
    # Small shapes consistent with the module: a TD3 critic for a low-dim
    # control problem.
    batch = 2
    state_dim = 4
    action_dim = 2
    hidden_sizes = (32, 32)

    key = jax.random.PRNGKey(0)
    key_params, key_state, key_action = jax.random.split(key, 3)

    params = init_qvalue_params(key_params, state_dim, action_dim, hidden_sizes)
    prepared = prepare_qvalue_params(params, state_dim)   # one-time prep pass

    state = jax.random.normal(key_state, (batch, state_dim), jnp.float32)
    action = jax.random.normal(key_action, (batch, action_dim), jnp.float32)

    out = jax.block_until_ready(
        qvalue_forward(state, action, prepared, activation="tanh"))
    ref = reference_forward(state, action, params, activation="tanh")
    assert out.shape == (batch,)
    assert jnp.allclose(out, ref, atol=1e-5, rtol=1e-5), "mismatch vs reference"

    # Exercise the multi-tile grid / batch-padding path at a larger batch.
    key_s2, key_a2 = jax.random.split(jax.random.PRNGKey(1))
    state2 = jax.random.normal(key_s2, (300, state_dim), jnp.float32)
    action2 = jax.random.normal(key_a2, (300, action_dim), jnp.float32)
    out2 = jax.block_until_ready(
        qvalue_forward(state2, action2, prepared, activation="tanh",
                       tile_b=128))
    ref2 = reference_forward(state2, action2, params, activation="tanh")
    assert out2.shape == (300,)
    assert jnp.allclose(out2, ref2, atol=1e-5, rtol=1e-5), "mismatch (tiled)"

    # bf16 streaming path: inputs stay bf16 in HBM/VMEM (half the read
    # traffic); the kernel casts to f32 and accumulates in f32.
    s_bf = state2.astype(jnp.bfloat16)
    a_bf = action2.astype(jnp.bfloat16)
    out3 = jax.block_until_ready(
        qvalue_forward(s_bf, a_bf, prepared, activation="tanh"))
    ref3 = reference_forward(s_bf.astype(jnp.float32),
                             a_bf.astype(jnp.float32),
                             params, activation="tanh")
    assert jnp.allclose(out3, ref3, atol=1e-5, rtol=1e-5), "mismatch (bf16)"

    print("KERNEL_OK")
</pallas_src>

<mosaic_0001>
module attributes {stable_mosaic.version = 11 : i64} {
  func.func @_qvalue_kernel(%arg0: i32, %arg1: memref<128x4xf32, #tpu.memory_space<vmem>>, %arg2: memref<128x2xf32, #tpu.memory_space<vmem>>, %arg3: memref<4x128xf32, #tpu.memory_space<vmem>>, %arg4: memref<2x128xf32, #tpu.memory_space<vmem>>, %arg5: memref<1x128xf32, #tpu.memory_space<vmem>>, %arg6: memref<128x128xf32, #tpu.memory_space<vmem>>, %arg7: memref<1x128xf32, #tpu.memory_space<vmem>>, %arg8: memref<1x128xf32, #tpu.memory_space<vmem>>, %arg9: memref<1x1xf32, #tpu.memory_space<vmem>>, %arg10: memref<1x128xf32, #tpu.memory_space<vmem>>) attributes {dimension_semantics = [#tpu.dimension_semantics<parallel>], iteration_bounds = array<i64: 1>, scalar_prefetch = 0 : i64, scratch_operands = 0 : i64, tpu.core_type = #tpu.core_type<tc>, window_params = [{transform_indices = @transform_0, window_bounds = array<i64: 128, 4>}, {transform_indices = @transform_1, window_bounds = array<i64: 128, 2>}, {pipeline_mode = #tpu.pipeline_mode<synchronous>, transform_indices = @transform_2, window_bounds = array<i64: 4, 128>}, {pipeline_mode = #tpu.pipeline_mode<synchronous>, transform_indices = @transform_3, window_bounds = array<i64: 2, 128>}, {pipeline_mode = #tpu.pipeline_mode<synchronous>, transform_indices = @transform_4, window_bounds = array<i64: 1, 128>}, {pipeline_mode = #tpu.pipeline_mode<synchronous>, transform_indices = @transform_5, window_bounds = array<i64: 128, 128>}, {pipeline_mode = #tpu.pipeline_mode<synchronous>, transform_indices = @transform_6, window_bounds = array<i64: 1, 128>}, {pipeline_mode = #tpu.pipeline_mode<synchronous>, transform_indices = @transform_7, window_bounds = array<i64: 1, 128>}, {pipeline_mode = #tpu.pipeline_mode<synchronous>, transform_indices = @transform_8, window_bounds = array<i64: 1, 1>}, {transform_indices = @transform_9, window_bounds = array<i64: 1, 128>}]} {
    %c0 = arith.constant 0 : index
    %c0_0 = arith.constant 0 : index
    %0 = vector.load %arg1[%c0, %c0_0] : memref<128x4xf32, #tpu.memory_space<vmem>>, vector<128x4xf32>
    %c0_1 = arith.constant 0 : index
    %c0_2 = arith.constant 0 : index
    %1 = vector.load %arg2[%c0_1, %c0_2] : memref<128x2xf32, #tpu.memory_space<vmem>>, vector<128x2xf32>
    %c0_3 = arith.constant 0 : index
    %c0_4 = arith.constant 0 : index
    %2 = vector.load %arg3[%c0_3, %c0_4] : memref<4x128xf32, #tpu.memory_space<vmem>>, vector<4x128xf32>
    %cst = arith.constant dense<0.000000e+00> : vector<128x128xf32>
    %3 = tpu.matmul %0, %2, %cst {dimension_numbers = #tpu.dot_dimension_numbers<[1], [0], [0], [1], [0, 0, 1, 1], [], []>} : vector<128x4xf32>, vector<4x128xf32>, vector<128x128xf32> -> vector<128x128xf32>
    %c0_5 = arith.constant 0 : index
    %c0_6 = arith.constant 0 : index
    %4 = vector.load %arg4[%c0_5, %c0_6] : memref<2x128xf32, #tpu.memory_space<vmem>>, vector<2x128xf32>
    %cst_7 = arith.constant dense<0.000000e+00> : vector<128x128xf32>
    %5 = tpu.matmul %1, %4, %cst_7 {dimension_numbers = #tpu.dot_dimension_numbers<[1], [0], [0], [1], [0, 0, 1, 1], [], []>} : vector<128x2xf32>, vector<2x128xf32>, vector<128x128xf32> -> vector<128x128xf32>
    %6 = arith.addf %3, %5 : vector<128x128xf32>
    %c0_8 = arith.constant 0 : index
    %c0_9 = arith.constant 0 : index
    %7 = vector.load %arg5[%c0_8, %c0_9] : memref<1x128xf32, #tpu.memory_space<vmem>>, vector<1x128xf32>
    %8 = vector.broadcast %7 : vector<1x128xf32> to vector<128x128xf32>
    %9 = arith.addf %6, %8 : vector<128x128xf32>
    %10 = math.tanh %9 : vector<128x128xf32>
    %c0_10 = arith.constant 0 : index
    %c0_11 = arith.constant 0 : index
    %11 = vector.load %arg6[%c0_10, %c0_11] : memref<128x128xf32, #tpu.memory_space<vmem>>, vector<128x128xf32>
    %cst_12 = arith.constant dense<0.000000e+00> : vector<128x128xf32>
    %12 = tpu.matmul %10, %11, %cst_12 {dimension_numbers = #tpu.dot_dimension_numbers<[1], [0], [0], [1], [0, 0, 1, 1], [], []>} : vector<128x128xf32>, vector<128x128xf32>, vector<128x128xf32> -> vector<128x128xf32>
    %c0_13 = arith.constant 0 : index
    %c0_14 = arith.constant 0 : index
    %13 = vector.load %arg7[%c0_13, %c0_14] : memref<1x128xf32, #tpu.memory_space<vmem>>, vector<1x128xf32>
    %14 = vector.broadcast %13 : vector<1x128xf32> to vector<128x128xf32>
    %15 = arith.addf %12, %14 : vector<128x128xf32>
    %16 = math.tanh %15 : vector<128x128xf32>
    %c0_15 = arith.constant 0 : index
    %c0_16 = arith.constant 0 : index
    %17 = vector.load %arg8[%c0_15, %c0_16] : memref<1x128xf32, #tpu.memory_space<vmem>>, vector<1x128xf32>
    %cst_17 = arith.constant dense<0.000000e+00> : vector<1x128xf32>
    %18 = tpu.matmul %17, %16, %cst_17 {dimension_numbers = #tpu.dot_dimension_numbers<[1], [1], [0], [0], [0, 0, 1, 0], [], []>} : vector<1x128xf32>, vector<128x128xf32>, vector<1x128xf32> -> vector<1x128xf32>
    %c0_18 = arith.constant 0 : index
    %c0_19 = arith.constant 0 : index
    %19 = vector.load %arg9[%c0_18, %c0_19] : memref<1x1xf32, #tpu.memory_space<vmem>>, vector<1x1xf32>
    %20 = vector.broadcast %19 : vector<1x1xf32> to vector<1x128xf32>
    %21 = arith.addf %18, %20 : vector<1x128xf32>
    %c0_20 = arith.constant 0 : index
    %c0_21 = arith.constant 0 : index
    %22 = vector.load %arg10[%c0_20, %c0_21] : memref<1x128xf32, #tpu.memory_space<vmem>>, vector<1x128xf32>
    tpu.vector_store %arg10[%c0_20, %c0_21], %21 {strides = array<i32>} : memref<1x128xf32, #tpu.memory_space<vmem>>, vector<1x128xf32>,
    return
  }
  func.func @transform_0(%arg0: i32) -> (i32, i32) {
    %c0_i32 = arith.constant 0 : i32
    %c0_i32_0 = arith.constant 0 : i32
    return %arg0, %c0_i32 : i32, i32
  }
  func.func @transform_1(%arg0: i32) -> (i32, i32) {
    %c0_i32 = arith.constant 0 : i32
    %c0_i32_0 = arith.constant 0 : i32
    return %arg0, %c0_i32 : i32, i32
  }
  func.func @transform_2(%arg0: i32) -> (i32, i32) {
    %c0_i32 = arith.constant 0 : i32
    %c0_i32_0 = arith.constant 0 : i32
    %c0_i32_1 = arith.constant 0 : i32
    return %c0_i32, %c0_i32_0 : i32, i32
  }
  func.func @transform_3(%arg0: i32) -> (i32, i32) {
    %c0_i32 = arith.constant 0 : i32
    %c0_i32_0 = arith.constant 0 : i32
    %c0_i32_1 = arith.constant 0 : i32
    return %c0_i32, %c0_i32_0 : i32, i32
  }
  func.func @transform_4(%arg0: i32) -> (i32, i32) {
    %c0_i32 = arith.constant 0 : i32
    %c0_i32_0 = arith.constant 0 : i32
    %c0_i32_1 = arith.constant 0 : i32
    return %c0_i32, %c0_i32_0 : i32, i32
  }
  func.func @transform_5(%arg0: i32) -> (i32, i32) {
    %c0_i32 = arith.constant 0 : i32
    %c0_i32_0 = arith.constant 0 : i32
    %c0_i32_1 = arith.constant 0 : i32
    return %c0_i32, %c0_i32_0 : i32, i32
  }
  func.func @transform_6(%arg0: i32) -> (i32, i32) {
    %c0_i32 = arith.constant 0 : i32
    %c0_i32_0 = arith.constant 0 : i32
    %c0_i32_1 = arith.constant 0 : i32
    return %c0_i32, %c0_i32_0 : i32, i32
  }
  func.func @transform_7(%arg0: i32) -> (i32, i32) {
    %c0_i32 = arith.constant 0 : i32
    %c0_i32_0 = arith.constant 0 : i32
    %c0_i32_1 = arith.constant 0 : i32
    return %c0_i32, %c0_i32_0 : i32, i32
  }
  func.func @transform_8(%arg0: i32) -> (i32, i32) {
    %c0_i32 = arith.constant 0 : i32
    %c0_i32_0 = arith.constant 0 : i32
    %c0_i32_1 = arith.constant 0 : i32
    return %c0_i32, %c0_i32_0 : i32, i32
  }
  func.func @transform_9(%arg0: i32) -> (i32, i32) {
    %c0_i32 = arith.constant 0 : i32
    %c0_i32_0 = arith.constant 0 : i32
    return %c0_i32, %arg0 : i32, i32
  }
}

</mosaic_0001>

<bundles_post_ra>
// kernel: tpu_custom_call.1
= control target key start
LH: loop header
LB: loop body
LE: loop exit
PB: predicated region body
PF: predicated region fallthrough
CT: control target
= control target key end

     0   :  { %s1450_s0 = inlined_call_operand.vmem [shape: f32[128,4], index: 0, kind: input, shape index: {}]   ;;  %s1451_s1 = inlined_call_operand.vmem [shape: f32[128,2], index: 1, kind: input, shape index: {}]   ;;  %s1452_s2 = inlined_call_operand.vmem [shape: f32[4,128], index: 2, kind: input, shape index: {}]   ;;  %s1453_s3 = inlined_call_operand.vmem [shape: f32[2,128], index: 3, kind: input, shape index: {}]   ;;  %s1454_s4 = inlined_call_operand.vmem [shape: f32[1,128], index: 4, kind: input, shape index: {}]   ;;  %s1455_s5 = inlined_call_operand.vmem [shape: f32[128,128], index: 5, kind: input, shape index: {}]   ;;  %s1456_s6 = inlined_call_operand.vmem [shape: f32[1,128], index: 6, kind: input, shape index: {}]   ;;  %s1457_s7 = inlined_call_operand.vmem [shape: f32[1,128], index: 7, kind: input, shape index: {}]   ;;  %s1458_s8 = inlined_call_operand.<no memory space> [shape: f32[1,1], index: 8, kind: input, shape index: {}]   ;;  %s1459_s9 = inlined_call_operand.hbm [shape: f32[1,128], index: 9, kind: output, shape index: {}]  }
   0x1   :  { %v14_v0 = vstv %s1458_s8 }
   0x2   :  { %15 = vst [vmem:[#allocation2] sm:$0x1] %v14_v0 }
   0x3   :  { %v68_v1 = vld [vmem:[%s1453_s3] sm:$0x3]  ;;  %vm118_vm0 = vcmask 1041408   ;;  %vm316_vm1 = vcmask 1043456   ;;  %vm69_vm2 = vcmask 15360   ;;  %vm267_vm3 = vcmask 31744  }
   0x4   :  { %v67_v2 = vld [vmem:[%s1452_s2] sm:$0xf]  ;;  %903 = vmatprep.subr.msk.mxu0 %vm118_vm0, %v68_v1  ;;  %v52_v5 = vld [vmem:[%s1451_s1 + $0x8] sm:$0xff]  ;;  %v53_v7 = vld [vmem:[%s1451_s1 + $0x10] sm:$0xff] }
   0x5   :  { %929 = vmatprep.subr.msk.mxu1 %vm316_vm1, %v67_v2  ;;  %v51_v3 = vld [vmem:[%s1451_s1] sm:$0xff]  ;;  %904 = vmatpush3.msk.msra.mxu0 %vm118_vm0, %v68_v1  ;;  %v36_v6 = vld [vmem:[%s1450_s0 + $0x8] sm:$0xff]  ;;  %v37_v8 = vld [vmem:[%s1450_s0 + $0x10] sm:$0xff] }
   0x6   :  { %v35_v4 = vld [vmem:[%s1450_s0] sm:$0xff]  ;;  %905 = vmatprep.mubr.msk.f32.mxu0 %vm69_vm2, %v51_v3  ;;  %930 = vmatpush3.msk.msra.mxu1 %vm316_vm1, %v67_v2  ;;  %v54_v9 = vld [vmem:[%s1451_s1 + $0x18] sm:$0xff]  ;;  %v56_v13 = vld [vmem:[%s1451_s1 + $0x28] sm:$0xff] }
   0x7   :  { %931 = vmatprep.mubr.msk.f32.mxu1 %vm267_vm3, %v35_v4  ;;  %906 = vmatmul.mubr.msk.f32.vlgmr.msra.gmra.mxu0 %vm69_vm2, %v52_v5  ;;  %v38_v10 = vld [vmem:[%s1450_s0 + $0x18] sm:$0xff]  ;;  %v55_v11 = vld [vmem:[%s1451_s1 + $0x20] sm:$0xff]  ;;  %v40_v14 = vld [vmem:[%s1450_s0 + $0x28] sm:$0xff] }
   0x8   :  { %932 = vmatmul.mubr.msk.f32.vlgmr.msra.gmra.mxu1 %vm267_vm3, %v36_v6  ;;  %908 = vmatprep.mubr.msk.f32.mxu0 %vm69_vm2, %v53_v7  ;;  %v39_v12 = vld [vmem:[%s1450_s0 + $0x20] sm:$0xff]  ;;  %v57_v15 = vld [vmem:[%s1451_s1 + $0x30] sm:$0xff]  ;;  %v519_v17 = vld [vmem:[%s1455_s5 + $0x78] sm:$0xff] }
   0x9   :  { %934 = vmatprep.mubr.msk.f32.mxu1 %vm267_vm3, %v37_v8  ;;  %v41_v16 = vld [vmem:[%s1450_s0 + $0x30] sm:$0xff]  ;;  %v58_v18 = vld [vmem:[%s1451_s1 + $0x38] sm:$0xff] }
   0xa   :  { %v42_v19 = vld [vmem:[%s1450_s0 + $0x38] sm:$0xff] }
   0xb   :  { %909 = vmatmul.mubr.msk.f32.gmra.mxu0 %vm69_vm2, %v54_v9 }
   0xc   :  { %935 = vmatmul.mubr.msk.f32.gmra.mxu1 %vm267_vm3, %v38_v10  ;;  %911 = vmatprep.mubr.msk.f32.mxu0 %vm69_vm2, %v55_v11 }
   0xd   :  { %937 = vmatprep.mubr.msk.f32.mxu1 %vm267_vm3, %v39_v12 }
   0xf   :  { %912 = vmatmul.mubr.msk.f32.gmra.mxu0 %vm69_vm2, %v56_v13 }
  0x10   :  { %938 = vmatmul.mubr.msk.f32.gmra.mxu1 %vm267_vm3, %v40_v14  ;;  %914 = vmatprep.mubr.msk.f32.mxu0 %vm69_vm2, %v57_v15 }
  0x11   :  { %940 = vmatprep.mubr.msk.f32.mxu1 %vm267_vm3, %v41_v16 }
  0x12   :  { %16 = vsyncpa [#allocation4], 0  ;;  %v59_v20 = vld [vmem:[%s1451_s1 + $0x40] sm:$0xff]  ;;  %955 = vmatprep.subr.mxu0 %v519_v17  ;;  %v518_v22 = vld [vmem:[%s1455_s5 + $0x70] sm:$0xff]  ;;  %vm1138_vm4 = vmmov 0   ;;  %s1140_s16 = smov [#allocation3]  }
  0x13   :  { %v43_v21 = vld [vmem:[%s1450_s0 + $0x40] sm:$0xff]  ;;  %956 = vmatpush3.msra.mxu0 %v519_v17  ;;  %v60_v23 = vld [vmem:[%s1451_s1 + $0x48] sm:$0xff]  ;;  %v61_v25 = vld [vmem:[%s1451_s1 + $0x50] sm:$0xff]  ;;  %s776_s17 = sshll.u32 %s1140_s16, 4  ;;  %s777_s17 = int_to_ptr.vmem [resolvable:$true] %s776_s17 }
  0x14   :  { %915 = vmatmul.mubr.msk.f32.gmra.mxu0 %vm69_vm2, %v58_v18  ;;  %941 = vmatmul.mubr.msk.f32.gmra.mxu1 %vm267_vm3, %v42_v19  ;;  %v44_v24 = vld [vmem:[%s1450_s0 + $0x48] sm:$0xff]  ;;  %v45_v26 = vld [vmem:[%s1450_s0 + $0x50] sm:$0xff]  ;;  %v62_v28 = vld [vmem:[%s1451_s1 + $0x58] sm:$0xff]  ;;  %s1115_s8 = scalar_lea.vmem %s777_s17, 16  ;;  %s1119_s18 = scalar_lea.vmem %s777_s17, 32 }
  0x15   :  { %917 = vmatprep.mubr.msk.f32.mxu0 %vm69_vm2, %v59_v20  ;;  %943 = vmatprep.mubr.msk.f32.mxu1 %vm267_vm3, %v43_v21  ;;  %v517_v27 = vld [vmem:[%s1455_s5 + $0x68] sm:$0xff]  ;;  %v46_v29 = vld [vmem:[%s1450_s0 + $0x58] sm:$0xff]  ;;  %v63_v30 = vld [vmem:[%s1451_s1 + $0x60] sm:$0xff]  ;;  %p1116_p0 = scmp.ne.s32.totalorder %s777_s17, %s1115_s8  ;;  %p1120_p1 = scmp.lt.s32.totalorder %s777_s17, %s777_s17 }
  0x16   :  { %957 = vmatprep.subr.mxu0 %v518_v22  ;;  %v47_v31 = vld [vmem:[%s1450_s0 + $0x60] sm:$0xff]  ;;  %v64_v33 = vld [vmem:[%s1451_s1 + $0x68] sm:$0xff]  ;;  %v65_v35 = vld [vmem:[%s1451_s1 + $0x70] sm:$0xff]  ;;  %p1121_p2 = scmp.lt.s32.totalorder %s1119_s18, %s1115_s8 }
  0x17   :  { %958 = vmatpush3.msra.mxu0 %v518_v22  ;;  %v516_v32 = vld [vmem:[%s1455_s5 + $0x60] sm:$0xff]  ;;  %v48_v34 = vld [vmem:[%s1450_s0 + $0x68] sm:$0xff]  ;;  %v49_v36 = vld [vmem:[%s1450_s0 + $0x70] sm:$0xff] }
  0x18   :  { %918 = vmatmul.mubr.msk.f32.gmra.mxu0 %vm69_vm2, %v60_v23  ;;  %944 = vmatmul.mubr.msk.f32.gmra.mxu1 %vm267_vm3, %v44_v24  ;;  %v515_v37 = vld [vmem:[%s1455_s5 + $0x58] sm:$0xff]  ;;  %v514_v40 = vld [vmem:[%s1455_s5 + $0x50] sm:$0xff]  ;;  %v513_v41 = vld [vmem:[%s1455_s5 + $0x48] sm:$0xff]  ;;  %p1122_p3 = por %p1121_p2, %p1120_p1 }
  0x19   :  { %920 = vmatprep.mubr.msk.f32.mxu0 %vm69_vm2, %v61_v25  ;;  %946 = vmatprep.mubr.msk.f32.mxu1 %vm267_vm3, %v45_v26  ;;  %v66_v38 = vld [vmem:[%s1451_s1 + $0x78] sm:$0xff]  ;;  %v512_v42 = vld [vmem:[%s1455_s5 + $0x40] sm:$0xff]  ;;  %v510_v44 = vld [vmem:[%s1455_s5 + $0x30] sm:$0xff] }
  0x1a   :  { %959 = vmatprep.subr.mxu0 %v517_v27  ;;  %v50_v39 = vld [vmem:[%s1450_s0 + $0x78] sm:$0xff]  ;;  %v509_v45 = vld [vmem:[%s1455_s5 + $0x28] sm:$0xff]  ;;  %v508_v46 = vld [vmem:[%s1455_s5 + $0x20] sm:$0xff]  ;;  %p1123_p4 = pnand %p1122_p3, %p1116_p0 }
  0x1b   :  { %960 = vmatpush3.msra.mxu0 %v517_v27  ;;  %v511_v43 = vld [vmem:[%s1455_s5 + $0x38] sm:$0xff]  ;;  %v506_v48 = vld [vmem:[%s1455_s5 + $0x10] sm:$0xff]  ;;  %v505_v49 = vld [vmem:[%s1455_s5 + $0x8] sm:$0xff] }
  0x1c   :  { %921 = vmatmul.mubr.msk.f32.gmra.mxu0 %vm69_vm2, %v62_v28  ;;  %947 = vmatmul.mubr.msk.f32.gmra.mxu1 %vm267_vm3, %v46_v29  ;;  %v507_v47 = vld [vmem:[%s1455_s5 + $0x18] sm:$0xff]  ;;  %v504_v50 = vld [vmem:[%s1455_s5] sm:$0xff] }
  0x1d   :  { %923 = vmatprep.mubr.msk.f32.mxu0 %vm69_vm2, %v63_v30  ;;  %949 = vmatprep.mubr.msk.f32.mxu1 %vm267_vm3, %v47_v31  ;;  %v1379_v54 = vld [vmem:[%s1454_s4] ss:$0 sm:$0xff] }
  0x1e   :  { %961 = vmatprep.subr.mxu0 %v516_v32 }
  0x1f   :  { %962 = vmatpush3.msra.mxu0 %v516_v32 }
  0x20   :  { %924 = vmatmul.mubr.msk.f32.gmra.mxu0 %vm69_vm2, %v64_v33  ;;  %950 = vmatmul.mubr.msk.f32.gmra.mxu1 %vm267_vm3, %v48_v34 }
  0x21   :  { %926 = vmatprep.mubr.msk.f32.mxu0 %vm69_vm2, %v65_v35  ;;  %952 = vmatprep.mubr.msk.f32.mxu1 %vm267_vm3, %v49_v36 }
  0x22   :  { %963 = vmatprep.subr.mxu0 %v515_v37 }
  0x23   :  { %964 = vmatpush3.msra.mxu0 %v515_v37 }
  0x24   :  { %927 = vmatmul.mubr.msk.f32.gmra.mxu0 %vm69_vm2, %v66_v38  ;;  %953 = vmatmul.mubr.msk.f32.gmra.mxu1 %vm267_vm3, %v50_v39 }
  0x25   :  { %965 = vmatprep.subr.mxu0 %v514_v40 }
  0x26   :  { %966 = vmatpush3.msra.mxu0 %v514_v40 }
  0x27   :  { %967 = vmatprep.subr.mxu0 %v513_v41 }
  0x28   :  { %968 = vmatpush3.msra.mxu0 %v513_v41 }
  0x29   :  { %969 = vmatprep.subr.mxu0 %v512_v42 }
  0x2a   :  { %970 = vmatpush3.msra.mxu0 %v512_v42 }
  0x2b   :  { %971 = vmatprep.subr.mxu0 %v511_v43 }
  0x2c   :  { %972 = vmatpush3.msra.mxu0 %v511_v43 }
  0x2d   :  { %973 = vmatprep.subr.mxu0 %v510_v44 }
  0x2e   :  { %974 = vmatpush3.msra.mxu0 %v510_v44 }
  0x2f   :  { %975 = vmatprep.subr.mxu0 %v509_v45 }
  0x30   :  { %976 = vmatpush3.msra.mxu0 %v509_v45 }
  0x31   :  { %977 = vmatprep.subr.mxu0 %v508_v46 }
  0x32   :  { %978 = vmatpush3.msra.mxu0 %v508_v46 }
  0x33   :  { %979 = vmatprep.subr.mxu0 %v507_v47 }
  0x34   :  { %980 = vmatpush3.msra.mxu0 %v507_v47 }
  0x35   :  { %981 = vmatprep.subr.mxu0 %v506_v48 }
  0x36   :  { %982 = vmatpush3.msra.mxu0 %v506_v48 }
  0x37   :  { %983 = vmatprep.subr.mxu0 %v505_v49 }
  0x38   :  { %984 = vmatpush3.msra.mxu0 %v505_v49 }
  0x39   :  { %985 = vmatprep.subr.mxu0 %v504_v50 }
  0x3a   :  { %986 = vmatpush3.msra.mxu0 %v504_v50 }
  0xc7   :  { %v907_v51 = vpop.f32.mrf.mxu0 }
  0xc8   :  { %v933_v52 = vpop.f32.mrf.mxu1 }
  0xc9   :  { %v392_v53 = vadd.f32 %v933_v52, %v907_v51  ;;  %v188_v55 = vpop.f32.mrf.mxu0 }
  0xca   :  { %v386_v56 = vpop.f32.mrf.mxu1 }
  0xcb   :  { %v387_v57 = vadd.f32 %v386_v56, %v188_v55  ;;  %v473_v58 = vadd.f32 %v1379_v54, %v392_v53  ;;  %v910_v59 = vpop.f32.mrf.mxu0 }
  0xcc   :  { %v936_v60 = vpop.f32.mrf.mxu1 }
  0xcd   :  { %v472_v61 = vadd.f32 %v1379_v54, %v387_v57  ;;  %v402_v62 = vadd.f32 %v936_v60, %v910_v59  ;;  %v198_v63 = vpop.f32.mrf.mxu0 }
  0xce   :  { %v396_v0 = vpop.f32.mrf.mxu1 }
  0xcf   :  { %1051 = vtanh.f32 %v472_v61  ;;  %v397_v1 = vadd.f32 %v396_v0, %v198_v63  ;;  %v475_v2 = vadd.f32 %v1379_v54, %v402_v62  ;;  %v913_v3 = vpop.f32.mrf.mxu0 }
  0xd0   :  { %1053 = vtanh.f32 %v473_v58  ;;  %v939_v4 = vpop.f32.mrf.mxu1 }
  0xd1   :  { %v474_v5 = vadd.f32 %v1379_v54, %v397_v1  ;;  %v412_v6 = vadd.f32 %v939_v4, %v913_v3  ;;  %v208_v7 = vpop.f32.mrf.mxu0 }
  0xd2   :  { %v406_v8 = vpop.f32.mrf.mxu1 }
  0xd3   :  { %1055 = vtanh.f32 %v474_v5  ;;  %v407_v9 = vadd.f32 %v406_v8, %v208_v7  ;;  %v477_v10 = vadd.f32 %v1379_v54, %v412_v6  ;;  %v689_v5 = vld [vmem:[#allocation2] sm:$0x1]  ;;  %v1139_v6 = vmov 0  }
  0xd4   :  { %1057 = vtanh.f32 %v475_v2  ;;  %v916_v11 = vpop.f32.mrf.mxu0  ;;  %v942_v12 = vpop.f32.mrf.mxu1  ;;  %1050 = vset.pattern.permute.xlu0 %v1139_v6 }
  0xd5   :  { %v476_v13 = vadd.f32 %v1379_v54, %v407_v9  ;;  %v422_v14 = vadd.f32 %v942_v12, %v916_v11  ;;  %692 = vperm.xlu0 %1050, %v689_v5  }
  0xd6   :  { %v218_v15 = vpop.f32.mrf.mxu0  ;;  %v416_v16 = vpop.f32.mrf.mxu1 }
  0xd7   :  { %1059 = vtanh.f32 %v476_v13  ;;  %v417_v17 = vadd.f32 %v416_v16, %v218_v15  ;;  %v479_v18 = vadd.f32 %v1379_v54, %v422_v14 }
  0xd8   :  { %1061 = vtanh.f32 %v477_v10  ;;  %v919_v19 = vpop.f32.mrf.mxu0  ;;  %v945_v20 = vpop.f32.mrf.mxu1 }
  0xd9   :  { %v478_v21 = vadd.f32 %v1379_v54, %v417_v17  ;;  %v432_v22 = vadd.f32 %v945_v20, %v919_v19 }
  0xda   :  { %v228_v23 = vpop.f32.mrf.mxu0  ;;  %v426_v24 = vpop.f32.mrf.mxu1 }
  0xdb   :  { %1063 = vtanh.f32 %v478_v21  ;;  %v427_v25 = vadd.f32 %v426_v24, %v228_v23  ;;  %v481_v27 = vadd.f32 %v1379_v54, %v432_v22  ;;  %v1408_v21 = vld [vmem:[%s1456_s6] ss:$0 sm:$0xff] }
  0xdc   :  { %v1052_v26 = vpop.eup %1051  ;;  %1065 = vtanh.f32 %v479_v18  ;;  %v922_v28 = vpop.f32.mrf.mxu0 }
  0xdd   :  { %v948_v29 = vpop.f32.mrf.mxu1  ;;  %v1054_v30 = vpop.eup %1053  ;;  %v480_v31 = vadd.f32 %v1379_v54, %v427_v25  ;;  %987 = vmatprep.mubr.f32.mxu0 %v1052_v26 }
  0xde   :  { %v442_v32 = vadd.f32 %v948_v29, %v922_v28  ;;  %v238_v33 = vpop.f32.mrf.mxu0  ;;  %988 = vmatmul.mubr.f32.vlgmr.msra.gmra.mxu0 %v1054_v30 }
  0xdf   :  { %v436_v34 = vpop.f32.mrf.mxu1  ;;  %1067 = vtanh.f32 %v480_v31 }
  0xe0   :  { %v437_v35 = vadd.f32 %v436_v34, %v238_v33  ;;  %v1056_v36 = vpop.eup %1055  ;;  %1069 = vtanh.f32 %v481_v27  ;;  %v483_v37 = vadd.f32 %v1379_v54, %v442_v32  ;;  %v925_v38 = vpop.f32.mrf.mxu0 }
  0xe1   :  { %v951_v39 = vpop.f32.mrf.mxu1  ;;  %v1058_v40 = vpop.eup %1057  ;;  %990 = vmatprep.mubr.f32.mxu0 %v1056_v36 }
  0xe2   :  { %v482_v41 = vadd.f32 %v1379_v54, %v437_v35  ;;  %v452_v42 = vadd.f32 %v951_v39, %v925_v38  ;;  %v248_v43 = vpop.f32.mrf.mxu0  ;;  %991 = vmatmul.mubr.f32.gmra.mxu0 %v1058_v40 }
  0xe3   :  { %v446_v44 = vpop.f32.mrf.mxu1 }
  0xe4   :  { %1071 = vtanh.f32 %v482_v41  ;;  %v447_v45 = vadd.f32 %v446_v44, %v248_v43  ;;  %v1060_v46 = vpop.eup %1059  ;;  %v485_v47 = vadd.f32 %v1379_v54, %v452_v42  ;;  %v928_v48 = vpop.f32.mrf.mxu0 }
  0xe5   :  { %1073 = vtanh.f32 %v483_v37  ;;  %v954_v49 = vpop.f32.mrf.mxu1  ;;  %v1062_v50 = vpop.eup %1061  ;;  %993 = vmatprep.mubr.f32.mxu0 %v1060_v46 }
  0xe6   :  { %v484_v51 = vadd.f32 %v1379_v54, %v447_v45  ;;  %v462_v52 = vadd.f32 %v954_v49, %v928_v48  ;;  %v258_v53 = vpop.f32.mrf.mxu0  ;;  %994 = vmatmul.mubr.f32.gmra.mxu0 %v1062_v50 }
  0xe7   :  { %v456_v55 = vpop.f32.mrf.mxu1 }
  0xe8   :  { %1075 = vtanh.f32 %v484_v51  ;;  %v457_v56 = vadd.f32 %v456_v55, %v258_v53  ;;  %v1064_v57 = vpop.eup %1063  ;;  %v487_v58 = vadd.f32 %v1379_v54, %v462_v52 }
  0xe9   :  { %1077 = vtanh.f32 %v485_v47  ;;  %v1066_v59 = vpop.eup %1065  ;;  %996 = vmatprep.mubr.f32.mxu0 %v1064_v57  ;;  %v688_v57 = vld [vmem:[%s1457_s7] sm:$0x1] }
  0xea   :  { %v486_v60 = vadd.f32 %v1379_v54, %v457_v56  ;;  %997 = vmatmul.mubr.f32.gmra.mxu0 %v1066_v59  ;;  %v1137_v54 = vmov 0.0  }
  0xeb   :  { %1011 = vmatprep.subr.mxu1 %v1137_v54  ;;  %1043 = vmatprep.mubr.msk.f32.mxu1 %vm1138_vm4, %v1137_v54 }
  0xec   :  { %1079 = vtanh.f32 %v486_v60  ;;  %v1068_v61 = vpop.eup %1067 }
  0xed   :  { %1081 = vtanh.f32 %v487_v58  ;;  %v1070_v62 = vpop.eup %1069  ;;  %999 = vmatprep.mubr.f32.mxu0 %v1068_v61  ;;  %v695_v58 = vlaneseq }
  0xee   :  { %1000 = vmatmul.mubr.f32.gmra.mxu0 %v1070_v62 }
  0xef   :  { %v696_v59 = vshrl.u32 %v695_v58, 7 }
  0xf1   :  { %v1072_v63 = vpop.eup %1071  ;;  %v697_v60 = vsub.s32 0, %v696_v59 }
  0xf2   :  { %v1074_v0 = vpop.eup %1073  ;;  %1002 = vmatprep.mubr.f32.mxu0 %v1072_v63 }
  0xf3   :  { %1003 = vmatmul.mubr.f32.gmra.mxu0 %v1074_v0 }
  0xf5   :  { %v1076_v1 = vpop.eup %1075 }
  0xf6   :  { %v1078_v2 = vpop.eup %1077  ;;  %1005 = vmatprep.mubr.f32.mxu0 %v1076_v1 }
  0xf7   :  { %1006 = vmatmul.mubr.f32.gmra.mxu0 %v1078_v2 }
  0xf9   :  { %v1080_v3 = vpop.eup %1079 }
  0xfa   :  { %v1082_v4 = vpop.eup %1081  ;;  %1008 = vmatprep.mubr.f32.mxu0 %v1080_v3 }
  0xfb   :  { %1009 = vmatmul.mubr.f32.gmra.mxu0 %v1082_v4 }
 0x150   :  { %v693_v61 = vpop.permute.xlu0 %692 }
 0x151   :  { %v698_v62 = vrot.slane %v693_v61, %v697_v60 }
 0x19e   :  { %v1399_v7 = vpop.f32.mrf.mxu0 }
 0x19f   :  { %v599_v48 = vadd.f32 %v1399_v7, %v1408_v21 }
 0x1a0   :  { %v1401_v8 = vpop.f32.mrf.mxu0 }
 0x1a1   :  { %v594_v50 = vadd.f32 %v1408_v21, %v1401_v8 }
 0x1a2   :  { %v992_v9 = vpop.f32.mrf.mxu0 }
 0x1a3   :  { %v609_v44 = vadd.f32 %v992_v9, %v1408_v21 }
 0x1a4   :  { %v1403_v10 = vpop.f32.mrf.mxu0 }
 0x1a5   :  { %v604_v46 = vadd.f32 %v1408_v21, %v1403_v10 }
 0x1a6   :  { %v995_v11 = vpop.f32.mrf.mxu0 }
 0x1a7   :  { %v619_v40 = vadd.f32 %v995_v11, %v1408_v21 }
 0x1a8   :  { %v613_v12 = vpop.f32.mrf.mxu0 }
 0x1a9   :  { %v614_v42 = vadd.f32 %v1408_v21, %v613_v12 }
 0x1aa   :  { %v998_v13 = vpop.f32.mrf.mxu0 }
 0x1ab   :  { %v629_v36 = vadd.f32 %v998_v13, %v1408_v21 }
 0x1ac   :  { %v623_v14 = vpop.f32.mrf.mxu0 }
 0x1ad   :  { %v624_v38 = vadd.f32 %v1408_v21, %v623_v14 }
 0x1ae   :  { %v1001_v15 = vpop.f32.mrf.mxu0 }
 0x1af   :  { %v639_v32 = vadd.f32 %v1001_v15, %v1408_v21 }
 0x1b0   :  { %v633_v16 = vpop.f32.mrf.mxu0 }
 0x1b1   :  { %v634_v34 = vadd.f32 %v1408_v21, %v633_v16 }
 0x1b3   :  { %v1004_v17 = vpop.f32.mrf.mxu0 }
 0x1b4   :  { %v649_v28 = vadd.f32 %v1004_v17, %v1408_v21 }
 0x1b5   :  { %v643_v18 = vpop.f32.mrf.mxu0 }
 0x1b6   :  { %v644_v30 = vadd.f32 %v1408_v21, %v643_v18 }
 0x1b7   :  { %v1007_v19 = vpop.f32.mrf.mxu0 }
 0x1b8   :  { %v659_v26 = vadd.f32 %v1007_v19, %v1408_v21 }
 0x1b9   :  { %v653_v20 = vpop.f32.mrf.mxu0 }
 0x1ba   :  { %v654_v27 = vadd.f32 %v1408_v21, %v653_v20 }
 0x1bb   :  { %v1010_v22 = vpop.f32.mrf.mxu0 }
 0x1bc   :  { %v669_v23 = vadd.f32 %v1010_v22, %v1408_v21 }
 0x1bd   :  { %v663_v24 = vpop.f32.mrf.mxu0 }
 0x1be   :  { %1083 = vtanh.f32 %v669_v23  ;;  %v664_v25 = vadd.f32 %v1408_v21, %v663_v24 }
 0x1c0   :  { %1085 = vtanh.f32 %v664_v25 }
 0x1c1   :  { %1087 = vtanh.f32 %v659_v26 }
 0x1c2   :  { %1089 = vtanh.f32 %v654_v27 }
 0x1c3   :  { %1091 = vtanh.f32 %v649_v28 }
 0x1c4   :  { %1093 = vtanh.f32 %v644_v30 }
 0x1c5   :  { %1095 = vtanh.f32 %v639_v32 }
 0x1c6   :  { %1097 = vtanh.f32 %v634_v34 }
 0x1c7   :  { %1099 = vtanh.f32 %v629_v36 }
 0x1c8   :  { %1101 = vtanh.f32 %v624_v38 }
 0x1c9   :  { %1103 = vtanh.f32 %v619_v40 }
 0x1ca   :  { %1105 = vtanh.f32 %v614_v42 }
 0x1cb   :  { %v1084_v29 = vpop.eup %1083  ;;  %1107 = vtanh.f32 %v609_v44 }
 0x1cc   :  { %1012 = vmatpush3.xpose.msra.mxu1 %v1084_v29  ;;  %1109 = vtanh.f32 %v604_v46 }
 0x1cd   :  { %1013 = vmatprep.subr.mxu1 %v1137_v54  ;;  %v1086_v31 = vpop.eup %1085  ;;  %1111 = vtanh.f32 %v599_v48 }
 0x1ce   :  { %v1088_v33 = vpop.eup %1087  ;;  %1113 = vtanh.f32 %v594_v50 }
 0x1cf   :  { %v1090_v35 = vpop.eup %1089 }
 0x1d0   :  { %1014 = vmatpush3.xpose.msra.mxu1 %v1086_v31  ;;  %v1092_v37 = vpop.eup %1091 }
 0x1d1   :  { %1015 = vmatprep.subr.mxu1 %v1137_v54  ;;  %v1094_v39 = vpop.eup %1093 }
 0x1d2   :  { %v1096_v41 = vpop.eup %1095 }
 0x1d3   :  { %v1098_v43 = vpop.eup %1097 }
 0x1d4   :  { %1016 = vmatpush3.xpose.msra.mxu1 %v1088_v33  ;;  %v1100_v45 = vpop.eup %1099 }
 0x1d5   :  { %1017 = vmatprep.subr.mxu1 %v1137_v54  ;;  %v1102_v47 = vpop.eup %1101 }
 0x1d6   :  { %v1104_v49 = vpop.eup %1103 }
 0x1d7   :  { %v1106_v51 = vpop.eup %1105 }
 0x1d8   :  { %1018 = vmatpush3.xpose.msra.mxu1 %v1090_v35  ;;  %v1108_v52 = vpop.eup %1107 }
 0x1d9   :  { %1019 = vmatprep.subr.mxu1 %v1137_v54  ;;  %v1110_v53 = vpop.eup %1109 }
 0x1da   :  { %v1112_v55 = vpop.eup %1111 }
 0x1db   :  { %v1114_v56 = vpop.eup %1113 }
 0x1dc   :  { %1020 = vmatpush3.xpose.msra.mxu1 %v1092_v37 }
 0x1dd   :  { %1021 = vmatprep.subr.mxu1 %v1137_v54 }
 0x1e0   :  { %1022 = vmatpush3.xpose.msra.mxu1 %v1094_v39 }
 0x1e1   :  { %1023 = vmatprep.subr.mxu1 %v1137_v54 }
 0x1e4   :  { %1024 = vmatpush3.xpose.msra.mxu1 %v1096_v41 }
 0x1e5   :  { %1025 = vmatprep.subr.mxu1 %v1137_v54 }
 0x1e8   :  { %1026 = vmatpush3.xpose.msra.mxu1 %v1098_v43 }
 0x1e9   :  { %1027 = vmatprep.subr.mxu1 %v1137_v54 }
 0x1ec   :  { %1028 = vmatpush3.xpose.msra.mxu1 %v1100_v45 }
 0x1ed   :  { %1029 = vmatprep.subr.mxu1 %v1137_v54 }
 0x1f0   :  { %1030 = vmatpush3.xpose.msra.mxu1 %v1102_v47 }
 0x1f1   :  { %1031 = vmatprep.subr.mxu1 %v1137_v54 }
 0x1f4   :  { %1032 = vmatpush3.xpose.msra.mxu1 %v1104_v49 }
 0x1f5   :  { %1033 = vmatprep.subr.mxu1 %v1137_v54 }
 0x1f8   :  { %1034 = vmatpush3.xpose.msra.mxu1 %v1106_v51 }
 0x1f9   :  { %1035 = vmatprep.subr.mxu1 %v1137_v54 }
 0x1fc   :  { %1036 = vmatpush3.xpose.msra.mxu1 %v1108_v52 }
 0x1fd   :  { %1037 = vmatprep.subr.mxu1 %v1137_v54 }
 0x200   :  { %1038 = vmatpush3.xpose.msra.mxu1 %v1110_v53 }
 0x201   :  { %1039 = vmatprep.subr.mxu1 %v1137_v54 }
 0x204   :  { %1040 = vmatpush3.xpose.msra.mxu1 %v1112_v55 }
 0x205   :  { %1041 = vmatprep.subr.mxu1 %v1137_v54 }
 0x208   :  { %1042 = vmatpush3.xpose.msra.mxu1 %v1114_v56 }
 0x20b   :  { %1044 = vmatmul.mubr.f32.vlgmr.msra.gmra.mxu1 %v688_v57 }
 0x2cb   :  { %v765_v63 = vpop.f32.mrf.mxu1 }
 0x2cc   :  { %v766_v0 = vadd.f32 %v765_v63, %v698_v62 }
 0x2cd   :  { %v1045_v1 = vpop.f32.mrf.mxu1 }
 0x2ce   :  { %769 = vst [vmem:[#allocation3] sm:$0x1] %v766_v0 }
 0x2cf   :  { %1126 = shalt.err (!%p1123_p4)
}
 0x2d0   :  { %779 = dma.vmem_to_hbm [thread:$0]  %s777_s17, 16, %s1459_s9, [#allocation4]  }
 0x2d1   :  { %1135 = dma.done.wait [#allocation4], 16  }
 0x2d2   :  { %1136 = vsyncadd [#allocation4], 4294967280 }
 0x2d3   :  { %783 = vsyncpa [#allocation4], 1 }

</bundles_post_ra>
